<compile_context>
chip_gen: v7x
topology: tpu7x:2x2x1
jax: 0.10.0
libtpu: 0.0.40
codegen_flags: <defaults>
</compile_context>

<pallas_src>
import functools

import jax
import jax.numpy as jnp
from jax import lax
from jax.experimental import pallas as pl
from jax.experimental.pallas import tpu as pltpu

EPS = 1e-6


def _skip_kernel(seed_ref, ab_ref, x_ref, w_ref, b_ref, o_ref,
                 *, dropout_p: float, tm: int):
    i = pl.program_id(0)
    x = x_ref[...]                                    # (tm, H) f32
    h = x.shape[-1]

    # ---- LayerNormalization (tutorial variant: unbiased std, eps on std) ----
    mean = jnp.mean(x, axis=-1, keepdims=True)
    diff = x - mean
    var = jnp.sum(diff * diff, axis=-1, keepdims=True) * (1.0 / max(h - 1, 1))
    std = jnp.sqrt(var)
    alpha = ab_ref[0]                                 # f32 scalars from SMEM
    beta = ab_ref[1]
    scale = alpha / (std + EPS)                       # (tm, 1): one divide per row
    normed = diff * scale + beta                      # fused mul-add per element

    # ---- sublayer: Linear(H, H) — bf16 operands, f32 accumulation on MXU ----
    sub = jnp.dot(normed.astype(jnp.bfloat16), w_ref[...],
                  preferred_element_type=jnp.float32)
    sub = sub + b_ref[...]                            # (tm, H) + (1, H), f32

    # ---- Dropout (inverted scaling), deterministic counter-based hash ----
    if dropout_p >= 1.0:
        sub = jnp.zeros_like(sub)
    elif dropout_p > 0.0:
        rows = lax.broadcasted_iota(jnp.int32, sub.shape, 0) + i * tm
        cols = lax.broadcasted_iota(jnp.int32, sub.shape, 1)
        ctr = (rows * h + cols).astype(jnp.uint32) + seed_ref[0].astype(jnp.uint32)
        # murmur3-style finalizer mix
        k = ctr * jnp.uint32(0xCC9E2D51)
        k = k ^ (k >> 15)
        k = k * jnp.uint32(0x85EBCA6B)
        k = k ^ (k >> 13)
        k = k * jnp.uint32(0xC2B2AE35)
        k = k ^ (k >> 16)
        r24 = jnp.bitwise_and(k, jnp.uint32(0x00FFFFFF)).astype(jnp.int32)
        u = r24.astype(jnp.float32) * jnp.float32(1.0 / (1 << 24))   # [0, 1)
        keep = u >= jnp.float32(dropout_p)
        sub = jnp.where(keep, sub * jnp.float32(1.0 / (1.0 - dropout_p)),
                        jnp.float32(0.0))

    # ---- residual add ----
    o_ref[...] = x + sub


def skip_connection(x, w, b, alpha, beta, *, dropout_p=0.1, seed=42, tm=256):
    """x: (B, S, H) f32; w: (H, H); b: (H,); alpha, beta: scalars."""
    B, S, H = x.shape
    M = B * S

    # Row tile: as large as possible (default 256), multiple of 8; pad rows.
    if M >= tm:
        tm_eff = tm
    else:
        tm_eff = max(8, ((M + 7) // 8) * 8)
    Mp = ((M + tm_eff - 1) // tm_eff) * tm_eff

    x2d = x.reshape(M, H).astype(jnp.float32)
    if Mp != M:
        x2d = jnp.pad(x2d, ((0, Mp - M), (0, 0)))

    w_bf16 = w.astype(jnp.bfloat16)                   # halve weight DMA / VMEM
    b2d = b.reshape(1, H).astype(jnp.float32)
    seed_arr = jnp.asarray([seed], dtype=jnp.int32)
    ab = jnp.asarray([alpha, beta], dtype=jnp.float32)   # scalars -> SMEM

    # Explicit scoped-VMEM budget: double-buffered in/out tiles + weight + slack.
    vmem_bytes = (4 * tm_eff * H * 4        # x + out, double-buffered, f32
                  + 2 * H * H * 2           # bf16 weight (2 pipeline buffers)
                  + 2 * H * 4               # bias
                  + 8 * tm_eff * H * 4      # kernel temporaries headroom
                  + (2 << 20))
    vmem_limit = int(min(max(vmem_bytes, 32 << 20), 64 << 20))

    kernel = functools.partial(_skip_kernel, dropout_p=float(dropout_p),
                               tm=tm_eff)

    out2d = pl.pallas_call(
        kernel,
        out_shape=jax.ShapeDtypeStruct((Mp, H), jnp.float32),
        grid_spec=pltpu.PrefetchScalarGridSpec(
            num_scalar_prefetch=2,                    # seed + (alpha, beta) in SMEM
            grid=(Mp // tm_eff,),
            in_specs=[
                pl.BlockSpec((tm_eff, H), lambda i, seed, ab: (i, 0)),  # x tile
                pl.BlockSpec((H, H), lambda i, seed, ab: (0, 0)),       # weight (bf16)
                pl.BlockSpec((1, H), lambda i, seed, ab: (0, 0)),       # bias
            ],
            out_specs=pl.BlockSpec((tm_eff, H), lambda i, seed, ab: (i, 0)),
        ),
        compiler_params=pltpu.CompilerParams(
            dimension_semantics=("parallel",),
            vmem_limit_bytes=vmem_limit),
    )(seed_arr, ab, x2d, w_bf16, b2d)

    if Mp != M:
        out2d = out2d[:M]
    return out2d.reshape(B, S, H)


def _reference(x, w, b, alpha, beta):
    """Pure-JAX reference with dropout disabled (for a sanity check)."""
    mean = jnp.mean(x, axis=-1, keepdims=True)
    diff = x - mean
    var = jnp.sum(diff * diff, axis=-1, keepdims=True) / (x.shape[-1] - 1)
    normed = alpha * diff / (jnp.sqrt(var) + EPS) + beta
    sub = jnp.einsum("bsh,hk->bsk", normed, w) + b
    return x + sub


if __name__ == "__main__":
    B, S, H = 2, 8, 32
    key = jax.random.PRNGKey(0)
    kx, kw, kb = jax.random.split(key, 3)

    x = jax.random.normal(kx, (B, S, H), dtype=jnp.float32)
    # Deterministic sublayer (Linear(H, H)) parameters.
    w = jax.random.normal(kw, (H, H), dtype=jnp.float32) * (1.0 / jnp.sqrt(H))
    b = jax.random.normal(kb, (H,), dtype=jnp.float32) * 0.01
    alpha = jnp.float32(1.0)   # LayerNormalization alpha (ones(1))
    beta = jnp.float32(0.0)    # LayerNormalization bias  (zeros(1))

    # Correctness sanity check with dropout disabled (bf16 GEMM tolerance).
    out_nodrop = skip_connection(x, w, b, alpha, beta, dropout_p=0.0, seed=42)
    ref = _reference(x, w, b, alpha, beta)
    assert jnp.allclose(out_nodrop, ref, rtol=1e-1, atol=1e-1), "mismatch vs reference"

    # Forward pass with dropout enabled (as in the module spec).
    out = skip_connection(x, w, b, alpha, beta, dropout_p=0.1, seed=42)
    jax.block_until_ready(out)
    assert out.shape == (B, S, H) and out.dtype == jnp.float32
    print("KERNEL_OK")
</pallas_src>

<mosaic_0001>
module attributes {stable_mosaic.version = 11 : i64} {
  func.func @_skip_kernel(%arg0: i32, %arg1: memref<1xi32, #tpu.memory_space<smem>>, %arg2: memref<2xf32, #tpu.memory_space<smem>>, %arg3: memref<16x32xf32, #tpu.memory_space<vmem>>, %arg4: memref<32x32xbf16, #tpu.memory_space<vmem>>, %arg5: memref<1x32xf32, #tpu.memory_space<vmem>>, %arg6: memref<16x32xf32, #tpu.memory_space<vmem>>) attributes {dimension_semantics = [#tpu.dimension_semantics<parallel>], iteration_bounds = array<i64: 1>, scalar_prefetch = 2 : i64, scratch_operands = 0 : i64, tpu.core_type = #tpu.core_type<tc>, window_params = [{transform_indices = @transform_0, window_bounds = array<i64: 16, 32>}, {pipeline_mode = #tpu.pipeline_mode<synchronous>, transform_indices = @transform_1, window_bounds = array<i64: 32, 32>}, {pipeline_mode = #tpu.pipeline_mode<synchronous>, transform_indices = @transform_2, window_bounds = array<i64: 1, 32>}, {transform_indices = @transform_3, window_bounds = array<i64: 16, 32>}]} {
    %c0 = arith.constant 0 : index
    %c0_0 = arith.constant 0 : index
    %0 = vector.load %arg3[%c0, %c0_0] : memref<16x32xf32, #tpu.memory_space<vmem>>, vector<16x32xf32>
    %cst = arith.constant dense<0.000000e+00> : vector<16xf32>
    %1 = vector.multi_reduction <add>, %0, %cst [1] : vector<16x32xf32> to vector<16xf32>
    %2 = vector.shape_cast %1 : vector<16xf32> to vector<16x1xf32>
    %cst_1 = arith.constant 3.200000e+01 : f32
    %3 = vector.broadcast %cst_1 : f32 to vector<16x1xf32>
    %4 = arith.divf %2, %3 : vector<16x1xf32>
    %5 = vector.broadcast %4 : vector<16x1xf32> to vector<16x32xf32>
    %6 = arith.subf %0, %5 : vector<16x32xf32>
    %7 = arith.mulf %6, %6 : vector<16x32xf32>
    %cst_2 = arith.constant dense<0.000000e+00> : vector<16xf32>
    %8 = vector.multi_reduction <add>, %7, %cst_2 [1] : vector<16x32xf32> to vector<16xf32>
    %9 = vector.shape_cast %8 : vector<16xf32> to vector<16x1xf32>
    %cst_3 = arith.constant 0.0322580636 : f32
    %10 = vector.broadcast %cst_3 : f32 to vector<16x1xf32>
    %11 = arith.mulf %9, %10 : vector<16x1xf32>
    %12 = math.sqrt %11 : vector<16x1xf32>
    %c0_4 = arith.constant 0 : index
    %13 = memref.load %arg2[%c0_4] : memref<2xf32, #tpu.memory_space<smem>>
    %c1 = arith.constant 1 : index
    %14 = memref.load %arg2[%c1] : memref<2xf32, #tpu.memory_space<smem>>
    %cst_5 = arith.constant 9.99999997E-7 : f32
    %15 = vector.broadcast %cst_5 : f32 to vector<16x1xf32>
    %16 = arith.addf %12, %15 : vector<16x1xf32>
    %17 = vector.broadcast %13 : f32 to vector<16x1xf32>
    %18 = arith.divf %17, %16 : vector<16x1xf32>
    %19 = vector.broadcast %18 : vector<16x1xf32> to vector<16x32xf32>
    %20 = arith.mulf %6, %19 : vector<16x32xf32>
    %21 = vector.broadcast %14 : f32 to vector<16x32xf32>
    %22 = arith.addf %20, %21 : vector<16x32xf32>
    %23 = arith.truncf %22 : vector<16x32xf32> to vector<16x32xbf16>
    %c0_6 = arith.constant 0 : index
    %c0_7 = arith.constant 0 : index
    %24 = vector.load %arg4[%c0_6, %c0_7] : memref<32x32xbf16, #tpu.memory_space<vmem>>, vector<32x32xbf16>
    %cst_8 = arith.constant dense<0.000000e+00> : vector<16x32xf32>
    %25 = tpu.matmul %23, %24, %cst_8 {dimension_numbers = #tpu.dot_dimension_numbers<[1], [0], [0], [1], [0, 0, 1, 1], [], []>} : vector<16x32xbf16>, vector<32x32xbf16>, vector<16x32xf32> -> vector<16x32xf32>
    %c0_9 = arith.constant 0 : index
    %c0_10 = arith.constant 0 : index
    %26 = vector.load %arg5[%c0_9, %c0_10] : memref<1x32xf32, #tpu.memory_space<vmem>>, vector<1x32xf32>
    %27 = vector.broadcast %26 : vector<1x32xf32> to vector<16x32xf32>
    %28 = arith.addf %25, %27 : vector<16x32xf32>
    %29 = arith.addf %0, %28 : vector<16x32xf32>
    %c0_11 = arith.constant 0 : index
    %c0_12 = arith.constant 0 : index
    %30 = vector.load %arg6[%c0_11, %c0_12] : memref<16x32xf32, #tpu.memory_space<vmem>>, vector<16x32xf32>
    tpu.vector_store %arg6[%c0_11, %c0_12], %29 {strides = array<i32>} : memref<16x32xf32, #tpu.memory_space<vmem>>, vector<16x32xf32>,
    return
  }
  func.func @transform_0(%arg0: i32, %arg1: memref<1xi32, #tpu.memory_space<smem>>, %arg2: memref<2xf32, #tpu.memory_space<smem>>) -> (i32, i32) {
    %c0_i32 = arith.constant 0 : i32
    %c0_i32_0 = arith.constant 0 : i32
    return %arg0, %c0_i32 : i32, i32
  }
  func.func @transform_1(%arg0: i32, %arg1: memref<1xi32, #tpu.memory_space<smem>>, %arg2: memref<2xf32, #tpu.memory_space<smem>>) -> (i32, i32) {
    %c0_i32 = arith.constant 0 : i32
    %c0_i32_0 = arith.constant 0 : i32
    %c0_i32_1 = arith.constant 0 : i32
    return %c0_i32, %c0_i32_0 : i32, i32
  }
  func.func @transform_2(%arg0: i32, %arg1: memref<1xi32, #tpu.memory_space<smem>>, %arg2: memref<2xf32, #tpu.memory_space<smem>>) -> (i32, i32) {
    %c0_i32 = arith.constant 0 : i32
    %c0_i32_0 = arith.constant 0 : i32
    %c0_i32_1 = arith.constant 0 : i32
    return %c0_i32, %c0_i32_0 : i32, i32
  }
  func.func @transform_3(%arg0: i32, %arg1: memref<1xi32, #tpu.memory_space<smem>>, %arg2: memref<2xf32, #tpu.memory_space<smem>>) -> (i32, i32) {
    %c0_i32 = arith.constant 0 : i32
    %c0_i32_0 = arith.constant 0 : i32
    return %arg0, %c0_i32 : i32, i32
  }
}

</mosaic_0001>

<bundles_post_ra>
// kernel: tpu_custom_call.1
= control target key start
LH: loop header
LB: loop body
LE: loop exit
PB: predicated region body
PF: predicated region fallthrough
CT: control target
= control target key end

     0   :  { %s422_s0 = inlined_call_operand.<no memory space> [shape: s32[1], index: 0, kind: input, shape index: {}]   ;;  %s423_s1 = inlined_call_operand.vmem [shape: f32[2], index: 1, kind: input, shape index: {}]   ;;  %s424_s2 = inlined_call_operand.hbm [shape: f32[16,32], index: 2, kind: input, shape index: {}]   ;;  %s425_s3 = inlined_call_operand.hbm [shape: bf16[32,32], index: 3, kind: input, shape index: {}]   ;;  %s426_s4 = inlined_call_operand.vmem [shape: f32[1,32], index: 4, kind: input, shape index: {}]   ;;  %s427_s5 = inlined_call_operand.hbm [shape: f32[16,32], index: 5, kind: output, shape index: {}]  }
   0x1   :  { %s11_s20 = sshll.u32 %s423_s1, 4  ;;  %s12_s20 = int_to_ptr.vmem [resolvable:$true] %s11_s20 }
   0x2   :  { %s231_s0 = scalar_lea.vmem %s12_s20, 16  ;;  %p236_p1 = scmp.lt.s32.totalorder %s12_s20, %s12_s20 }
   0x3   :  { %p232_p0 = scmp.ne.s32.totalorder %s12_s20, %s231_s0  ;;  %p237_p2 = scmp.lt.s32.totalorder %s231_s0, %s231_s0 }
   0x5   :  { %p238_p3 = por %p237_p2, %p236_p1 }
   0x7   :  { %p239_p4 = pnand %p238_p3, %p232_p0 }
   0x9   :  { %242 = shalt.err (!%p239_p4)  }
   0xa   :  { %s317_s21 = smov [#allocation4]  }
   0xb   :  { %14 = dma.vmem_to_smem %s12_s20, 16, %s317_s21, [#allocation2] }
   0xc   :  { %309 = dma.done.wait [#allocation2], 16 }
   0xd   :  { %310 = vsyncadd [#allocation2], 4294967280 }
   0xe   :  { %16 = sfence }
   0xf   :  { %17 = vsyncpa [#allocation6], 0 }
  0x10   :  { %18 = vsyncpa [#allocation9], 0 }
  0x11   :  { %19 = vsyncpa [#allocation7], 0  ;;  %s318_s22 = smov [#allocation5]   ;;  %s243_s25 = scalar_lea.hbm %s424_s2, 256 }
  0x12   :  { %s25_s23 = sshll.u32 %s318_s22, 4  ;;  %p244_p5 = scmp.ne.s32.totalorder %s424_s2, %s243_s25  ;;  %s26_s23 = int_to_ptr.vmem [resolvable:$true] %s25_s23 }
  0x13   :  { %p247_p6 = scmp.lt.u32.totalorder %s243_s25, %s424_s2 }
  0x15   :  { %p249_p7 = pnand %p247_p6, %p244_p5 }
  0x17   :  { %252 = shalt.err (!%p249_p7)
}
  0x18   :  { %s253_s30 = scalar_lea.vmem %s26_s23, 256  ;;  %p258_p9 = scmp.lt.s32.totalorder %s26_s23, %s26_s23 }
  0x19   :  { %p254_p8 = scmp.ne.s32.totalorder %s26_s23, %s253_s30  ;;  %p259_p10 = scmp.lt.s32.totalorder %s253_s30, %s253_s30 }
  0x1b   :  { %p260_p11 = por %p259_p10, %p258_p9 }
  0x1d   :  { %p261_p12 = pnand %p260_p11, %p254_p8 }
  0x1f   :  { %264 = shalt.err (!%p261_p12)
}
  0x20   :  { %s319_s6 = smov 128   ;;  %s320_s7 = smov 8  }
  0x21   :  { %31 = dma.hbm_to_vmem [thread:$0]  %s424_s2, 256, %s26_s23, [#allocation6], %s319_s6, %s319_s6, %s320_s7  }
  0x22   :  { %s321_s10 = smov [#allocation8]   ;;  %s265_s14 = scalar_lea.hbm %s425_s3, 256 }
  0x23   :  { %s37_s11 = sshll.u32 %s321_s10, 4  ;;  %p266_p13 = scmp.ne.s32.totalorder %s425_s3, %s265_s14  ;;  %s38_s11 = int_to_ptr.vmem [resolvable:$true] %s37_s11 }
  0x24   :  { %p269_p0 = scmp.lt.u32.totalorder %s265_s14, %s425_s3 }
  0x26   :  { %p271_p1 = pnand %p269_p0, %p266_p13 }
  0x28   :  { %274 = shalt.err (!%p271_p1)
}
  0x29   :  { %s275_s19 = scalar_lea.vmem %s38_s11, 256  ;;  %p280_p3 = scmp.lt.s32.totalorder %s38_s11, %s38_s11 }
  0x2a   :  { %p276_p2 = scmp.ne.s32.totalorder %s38_s11, %s275_s19  ;;  %p281_p4 = scmp.lt.s32.totalorder %s275_s19, %s275_s19 }
  0x2c   :  { %p282_p5 = por %p281_p4, %p280_p3 }
  0x2e   :  { %p283_p6 = pnand %p282_p5, %p276_p2 }
  0x30   :  { %286 = shalt.err (!%p283_p6)
}
  0x31   :  { %s322_s2 = smov 64   ;;  %s323_s20 = smov 4  }
  0x32   :  { %43 = dma.hbm_to_vmem [thread:$0]  %s425_s3, 256, %s38_s11, [#allocation9], %s322_s2, %s322_s2, %s323_s20  }
  0x33   :  { %311 = dma.done.wait [#allocation6], 256  }
  0x34   :  { %312 = vsyncadd [#allocation6], 4294967040 }
  0x35   :  { %313 = dma.done.wait [#allocation9], 256  }
  0x36   :  { %314 = vsyncadd [#allocation9], 4294967040  ;;  %vm55_vm0 = vcmask 261120   ;;  %v387_v0 = vld [vmem:[#allocation5] sm:$0xff]  ;;  %v389_v1 = vld [vmem:[#allocation5 + $0x8] sm:$0xff]  ;;  %v324_v15 = vmov 0.0  }
  0x37   :  { %v56_v2 = vsel %vm55_vm0, %v387_v0, 0.0  ;;  %v59_v3 = vsel %vm55_vm0, %v389_v1, 0.0  ;;  %v221_v14 = vld [vmem:[#allocation8] sm:$0xff]   ;;  %203 = vmatprep.subr.bf16.mxu0 %v324_v15  ;;  %vm325_vm1 = vmmov 0   ;;  %v222_v16 = vld [vmem:[#allocation8 + $0x8] sm:$0xff]   ;;  %s91_s3 = sld [smem:[#allocation4]] }
  0x38   :  { %57 = vadd.xlane.f32.xlu0 %v56_v2  ;;  %207 = vmatprep.mubr.msk.bf16.mxu0 %vm325_vm1, %v324_v15  ;;  %s195_s22 = sld [smem:[#allocation4 + $0x1]]  ;;  %v196_v44 = vld [vmem:[%s426_s4] ss:$0 sm:$0xff]  ;;  %s326_s24 = smov [#allocation10]  }
  0x39   :  { %204 = vmatpush3.bf16.msra.mxu0 %v221_v14  ;;  %s182_s25 = sshll.u32 %s326_s24, 4  ;;  %s183_s25 = int_to_ptr.vmem [resolvable:$true] %s182_s25 }
  0x3a   :  { %205 = vmatprep.subr.bf16.mxu0 %v324_v15  ;;  %s287_s26 = scalar_lea.vmem %s183_s25, 256  ;;  %p292_p8 = scmp.lt.s32.totalorder %s183_s25, %s183_s25 }
  0x3b   :  { %p288_p7 = scmp.ne.s32.totalorder %s183_s25, %s287_s26  ;;  %p293_p9 = scmp.lt.s32.totalorder %s287_s26, %s287_s26 }
  0x3c   :  { %60 = vadd.xlane.f32.xlu0 %v59_v3 }
  0x3d   :  { %206 = vmatpush3.bf16.msra.mxu0 %v222_v16  ;;  %v95_v33 = vstv %s91_s3  ;;  %p294_p10 = por %p293_p9, %p292_p8 }
  0x3e   :  { %v102_v39 = vstv %s195_s22 }
  0x3f   :  { %p295_p11 = pnand %p294_p10, %p288_p7 }
  0xc5   :  { %v58_v4 = vpop.xlane.xlu0 %57 }
  0xc6   :  { %v63_v5 = vmul.f32 0.03125, %v58_v4 }
  0xc8   :  { %v65_v6 = vsub.f32 %v387_v0, %v63_v5 }
  0xc9   :  { %v61_v7 = vpop.xlane.xlu0 %60 }
  0xca   :  { %v64_v8 = vmul.f32 0.03125, %v61_v7  ;;  %v67_v9 = vmul.f32 %v65_v6, %v65_v6 }
  0xcc   :  { %v66_v10 = vsub.f32 %v389_v1, %v64_v8  ;;  %v69_v11 = vsel %vm55_vm0, %v67_v9, 0.0 }
  0xcd   :  { %70 = vadd.xlane.f32.xlu1 %v69_v11 }
  0xce   :  { %v68_v12 = vmul.f32 %v66_v10, %v66_v10 }
  0xd0   :  { %v72_v13 = vsel %vm55_vm0, %v68_v12, 0.0 }
  0xd1   :  { %73 = vadd.xlane.f32.xlu1 %v72_v13 }
 0x15a   :  { %v71_v17 = vpop.xlane.xlu1 %70 }
 0x15b   :  { %v75_v18 = vmul.f32 0.032258064, %v71_v17 }
 0x15d   :  { %223 = vrsqrt.f32 %v75_v18  ;;  %vm79_vm2 = vcmp.eq.f32.partialorder %v75_v18, inf  ;;  %v82_v23 = vand.u32 2147483648, %v75_v18  ;;  %vm81_vm3 = vcmp.eq.f32.partialorder %v75_v18, 0.0 }
 0x15e   :  { %v74_v19 = vpop.xlane.xlu1 %73 }
 0x15f   :  { %v76_v20 = vmul.f32 0.032258064, %v74_v19 }
 0x161   :  { %225 = vrsqrt.f32 %v76_v20  ;;  %vm86_vm4 = vcmp.eq.f32.partialorder %v76_v20, inf  ;;  %v89_v29 = vand.u32 2147483648, %v76_v20  ;;  %vm88_vm5 = vcmp.eq.f32.partialorder %v76_v20, 0.0 }
 0x167   :  { %v224_v21 = vpop.eup %223 }
 0x168   :  { %v78_v22 = vmul.f32 %v224_v21, %v75_v18 }
 0x16a   :  { %v80_v24 = vsel %vm79_vm2, %v75_v18, %v78_v22 }
 0x16b   :  { %v226_v25 = vpop.eup %225  ;;  %v83_v26 = vsel %vm81_vm3, %v82_v23, %v80_v24 }
 0x16c   :  { %v93_v27 = vadd.f32 1e-06, %v83_v26  ;;  %v85_v28 = vmul.f32 %v226_v25, %v76_v20 }
 0x16e   :  { %227 = vrcp.f32 %v93_v27  ;;  %v87_v30 = vsel %vm86_vm4, %v76_v20, %v85_v28 }
 0x16f   :  { %v90_v31 = vsel %vm88_vm5, %v89_v29, %v87_v30 }
 0x170   :  { %v94_v32 = vadd.f32 1e-06, %v90_v31 }
 0x172   :  { %229 = vrcp.f32 %v94_v32 }
 0x178   :  { %v228_v34 = vpop.eup %227 }
 0x179   :  { %v97_v35 = vmul.f32 %v228_v34, %v95_v33 }
 0x17b   :  { %v100_v38 = vmul.f32 %v97_v35, %v65_v6 }
 0x17c   :  { %v230_v36 = vpop.eup %229 }
 0x17d   :  { %v99_v37 = vmul.f32 %v230_v36, %v95_v33  ;;  %v103_v41 = vadd.f32 %v102_v39, %v100_v38 }
 0x17f   :  { %v101_v40 = vmul.f32 %v99_v37, %v66_v10 }
 0x181   :  { %v104_v42 = vadd.f32 %v102_v39, %v101_v40 }
 0x183   :  { %v105_v43 = vpack.c.bf16 %v104_v42, %v103_v41 }
 0x185   :  { %208 = vmatmul.mubr.msk.bf16.vlgmr.msra.gmra.mrb[0].mxu0 %vm55_vm0, %v105_v43 }
 0x258   :  { %v166_v45 = vpop.f32.mrb[0].mxu0 }
 0x259   :  { %v167_v46 = vadd.f32 %v196_v44, %v166_v45  ;;  %v209_v47 = vpop.f32.mrb[1].mxu0 }
 0x25a   :  { %v169_v48 = vpop.f32.mrb[2].mxu0 }
 0x25b   :  { %v173_v49 = vadd.f32 %v167_v46, %v387_v0  ;;  %v170_v50 = vadd.f32 %v196_v44, %v169_v48  ;;  %v210_v51 = vpop.f32.mrb[3].mxu0 }
 0x25d   :  { %175 = vst.msk [vmem:[#allocation10] sm:$0xff] %vm55_vm0, %v173_v49  ;;  %v174_v52 = vadd.f32 %v170_v50, %v389_v1 }
 0x25f   :  { %176 = vst.msk [vmem:[#allocation10 + $0x8] sm:$0xff] %vm55_vm0, %v174_v52 }
 0x260   :  { %298 = shalt.err (!%p295_p11)
}
 0x261   :  { %s299_s28 = scalar_lea.hbm %s427_s5, 256 }
 0x262   :  { %p300_p12 = scmp.ne.s32.totalorder %s427_s5, %s299_s28  ;;  %p303_p13 = scmp.lt.u32.totalorder %s299_s28, %s427_s5 }
 0x264   :  { %p305_p0 = pnand %p303_p13, %p300_p12 }
 0x266   :  { %308 = shalt.err (!%p305_p0)
}
 0x267   :  { %188 = dma.vmem_to_hbm [thread:$0]  %s183_s25, 256, %s427_s5, [#allocation7], %s319_s6, %s319_s6, %s320_s7  }
 0x268   :  { %315 = dma.done.wait [#allocation7], 256  }
 0x269   :  { %316 = vsyncadd [#allocation7], 4294967040 }
 0x26a   :  { %192 = vsyncpa [#allocation6], 1 }
 0x26b   :  { %193 = vsyncpa [#allocation9], 1 }
 0x26c   :  { %194 = vsyncpa [#allocation7], 1 }

</bundles_post_ra>
